<compile_context>
chip_gen: v7x
topology: tpu7x:2x2x1
jax: 0.10.0
libtpu: 0.0.40
codegen_flags: <defaults>
</compile_context>

<pallas_src>
import functools
import math

import jax
import jax.numpy as jnp
from jax.experimental import pallas as pl
from jax.experimental.pallas import tpu as pltpu


# ---------------------------------------------------------------------------
# Kernels
# ---------------------------------------------------------------------------

def _scale_and_store(x, xf, inv, w_ref, o_ref):
    """Final (x * inv) * w in the cheapest dtype; store as o_ref.dtype."""
    if x.dtype == jnp.float32:
        out = (xf * inv) * w_ref[...].astype(jnp.float32)
    else:
        # bf16/fp16-native scaling (v6e/v7x have sub-f32 VALU); the reduction
        # that produced `inv` stays in f32, so accuracy is preserved.
        out = (x * inv.astype(x.dtype)) * w_ref[...].astype(x.dtype)
    o_ref[...] = out.astype(o_ref.dtype)


def _rmsnorm_kernel(x_ref, w_ref, o_ref, *, eps: float, inv_d: float):
    # x_ref: (tile_rows, D) block; w_ref: (1, D) resident in VMEM.
    x = x_ref[...]
    xf = x.astype(jnp.float32)
    ss = jnp.sum(xf * xf, axis=-1, keepdims=True)          # XLU reduce (f32)
    inv = jax.lax.rsqrt(ss * inv_d + eps)                   # EUP rsqrt
    _scale_and_store(x, xf, inv, w_ref, o_ref)


def _rmsnorm_packed_kernel(x_ref, w_ref, m_ref, o_ref, *, eps: float,
                           inv_d: float):
    # Lane-packed path: each kernel row holds k = lanes/D logical rows.
    #   x_ref: (tile_rows, k*D); w_ref: (1, k*D) = weight tiled k times;
    #   m_ref: (k*D, k*D) block-diagonal 0/1 matrix (bf16, resident in VMEM).
    # ss = (x*x) @ M gives the per-logical-row sum of squares already
    # broadcast across that row's D lanes — one matmul on the idle MXU.
    x = x_ref[...]
    xf = x.astype(jnp.float32)
    y = xf * xf
    # Exact hi/lo bf16 split keeps ~f32 accuracy while using the native bf16
    # MXU path (MXU is otherwise idle; this op is HBM-bound).
    y_hi = y.astype(jnp.bfloat16)
    y_lo = (y - y_hi.astype(jnp.float32)).astype(jnp.bfloat16)
    m = m_ref[...]
    ss = (jnp.dot(y_hi, m, preferred_element_type=jnp.float32)
          + jnp.dot(y_lo, m, preferred_element_type=jnp.float32))
    inv = jax.lax.rsqrt(ss * inv_d + eps)                   # per-lane rsqrt (EUP)
    _scale_and_store(x, xf, inv, w_ref, o_ref)


# ---------------------------------------------------------------------------
# Wrapper helpers
# ---------------------------------------------------------------------------

def _sublane_pack(dtype) -> int:
    # 8 sublanes of 32-bit; narrower dtypes pack along the sublane axis.
    itemsize = jnp.dtype(dtype).itemsize
    return max(8, 32 // max(1, itemsize))


def _round_up(x: int, m: int) -> int:
    return ((x + m - 1) // m) * m


def _tpu_generation() -> int:
    try:
        kind = jax.devices()[0].device_kind.lower()
    except Exception:
        return 0
    for g in (7, 6, 5, 4):
        if f"v{g}" in kind:
            return g
    return 0


def _tiling_budget(gen: int) -> tuple[int, int]:
    """(target f32-equivalent input-block bytes, vmem_limit_bytes) per gen."""
    if gen >= 7:   # v7x: 64 MiB VMEM/TC, ~3 TB/s HBM -> bigger blocks, tight cap
        return 6 << 20, 48 << 20
    if gen == 6:   # v6e: 128 MiB VMEM, ~1.4 TB/s HBM
        return 12 << 20, 88 << 20
    if gen == 5:   # v5e: 128 MiB VMEM, ~0.8 TB/s HBM (already near roofline)
        return 6 << 20, 80 << 20
    return 4 << 20, 40 << 20


def _pick_tile_rows(rows: int, width: int, dtype, target_bytes: int) -> int:
    """Row tile giving ~target_bytes per (f32-equivalent) input block,
    multiple of the sublane pack, never larger than the padded row count."""
    pack = _sublane_pack(dtype)
    eff_item = max(4, jnp.dtype(dtype).itemsize)   # size against f32 temps
    tr = target_bytes // max(1, width * eff_item)
    tr = max(pack, (tr // pack) * pack)
    return min(tr, _round_up(rows, pack))


# ---------------------------------------------------------------------------
# Public entry point
# ---------------------------------------------------------------------------

def rmsnorm(x: jax.Array, weight: jax.Array, eps: float = 1e-5,
            *, tile_rows: int | None = None) -> jax.Array:
    """RMSNorm over the last axis of x, scaled by `weight` (shape (D,))."""
    orig_shape = x.shape
    d_model = orig_shape[-1]
    rows = math.prod(orig_shape[:-1]) if len(orig_shape) > 1 else 1
    if rows == 0 or d_model == 0:
        return x
    x2d = x.reshape(rows, d_model)

    gen = _tpu_generation()
    target_bytes, vmem_limit = _tiling_budget(gen)

    # Lane-dense packing for narrow feature dims (e.g. D=32): pack k logical
    # rows per 128-lane kernel row via a free row-major reshape.
    pack_k = 1
    if d_model % 128 != 0 and 128 % d_model == 0:
        k = 128 // d_model
        if rows % k == 0:
            pack_k = k
    # TODO(synk): D that neither divides nor is a multiple of 128 falls back to
    # the straightforward path with masked (partial-lane) stores.
    kd = pack_k * d_model
    rows_k = rows // pack_k
    x_k = x2d.reshape(rows_k, kd)                         # free (row-major merge)
    w_k = (jnp.tile(weight, pack_k) if pack_k > 1 else weight).reshape(1, kd)

    pack = _sublane_pack(x.dtype)
    if tile_rows is None:
        tile_rows = _pick_tile_rows(rows_k, kd, x.dtype, target_bytes)
    else:
        tile_rows = max(pack, _round_up(int(tile_rows), pack))
        tile_rows = min(tile_rows, _round_up(rows_k, pack))
    if gen >= 7:
        # Keep >= 2 grid steps so both v7x TensorCores get work on the
        # "parallel" axis.
        tile_rows = min(tile_rows,
                        max(pack, _round_up(pl.cdiv(rows_k, 2), pack)))

    grid = (pl.cdiv(rows_k, tile_rows),)   # ragged tail handled by Pallas

    itemsize = jnp.dtype(x.dtype).itemsize
    cost = pl.CostEstimate(
        flops=3 * rows * d_model + (2 * rows_k * kd * kd if pack_k > 1 else 0),
        transcendentals=rows_k * (kd if pack_k > 1 else 1),
        bytes_accessed=2 * rows * d_model * itemsize
        + kd * jnp.dtype(weight.dtype).itemsize,
    )

    resident = pl.BlockSpec(memory_space=pltpu.MemorySpace.VMEM)
    in_row_spec = pl.BlockSpec((tile_rows, kd), lambda i: (i, 0))
    out_row_spec = pl.BlockSpec((tile_rows, kd), lambda i: (i, 0))

    if pack_k > 1:
        seg = jnp.arange(kd, dtype=jnp.int32) // d_model
        seg_mat = (seg[:, None] == seg[None, :]).astype(jnp.bfloat16)
        kernel = functools.partial(_rmsnorm_packed_kernel, eps=eps,
                                   inv_d=1.0 / d_model)
        in_specs = [in_row_spec, resident, resident]
        args = (x_k, w_k, seg_mat)
    else:
        kernel = functools.partial(_rmsnorm_kernel, eps=eps,
                                   inv_d=1.0 / d_model)
        in_specs = [in_row_spec, resident]
        args = (x_k, w_k)

    out = pl.pallas_call(
        kernel,
        out_shape=jax.ShapeDtypeStruct((rows_k, kd), x.dtype),
        grid_spec=pltpu.PrefetchScalarGridSpec(
            num_scalar_prefetch=0,
            grid=grid,
            in_specs=in_specs,
            out_specs=out_row_spec,
        ),
        compiler_params=pltpu.CompilerParams(
            dimension_semantics=("parallel",),
            vmem_limit_bytes=vmem_limit,
        ),
        cost_estimate=cost,
    )(*args)

    return out.reshape(orig_shape)


# ---------------------------------------------------------------------------
# Demo / self-test
# ---------------------------------------------------------------------------

if __name__ == "__main__":
    eps = 1e-5

    # Case 1: module's natural small shape (batch=2, seq=8, d_model=32), f32.
    # D=32 exercises the lane-packed path (4 logical rows per 128-lane row).
    batch, seq, d_model = 2, 8, 32
    x = jax.random.normal(jax.random.PRNGKey(0), (batch, seq, d_model),
                          dtype=jnp.float32)
    weight = jnp.ones((d_model,), dtype=jnp.float32)     # torch.ones init
    out = jax.block_until_ready(rmsnorm(x, weight, eps))
    ref = x * jax.lax.rsqrt(jnp.mean(x * x, -1, keepdims=True) + eps) * weight
    assert out.shape == x.shape and out.dtype == x.dtype
    assert jnp.allclose(out, ref, atol=1e-4, rtol=1e-4)

    # Case 2: ragged rows (39 rows, tile 8) -> partial trailing block, no pad.
    x2 = jax.random.normal(jax.random.PRNGKey(1), (3, 13, d_model),
                           dtype=jnp.float32)
    out2 = jax.block_until_ready(rmsnorm(x2, weight, eps, tile_rows=8))
    ref2 = x2 * jax.lax.rsqrt(jnp.mean(x2 * x2, -1, keepdims=True) + eps) * weight
    assert jnp.allclose(out2, ref2, atol=1e-5, rtol=1e-5)

    # Case 3: bf16 with a 128-multiple feature dim (regular lane-dense path,
    # f32 reduction + bf16 final scaling).
    d3 = 256
    x3 = jax.random.normal(jax.random.PRNGKey(2), (4, 16, d3)).astype(jnp.bfloat16)
    w3 = jnp.ones((d3,), dtype=jnp.bfloat16)
    out3 = jax.block_until_ready(rmsnorm(x3, w3, eps))
    x3f = x3.astype(jnp.float32)
    ref3 = x3f * jax.lax.rsqrt(jnp.mean(x3f * x3f, -1, keepdims=True) + eps)
    assert out3.dtype == jnp.bfloat16
    assert jnp.allclose(out3.astype(jnp.float32), ref3, atol=0.03, rtol=0.03)

    print("KERNEL_OK")
</pallas_src>

<mosaic_0001>
module attributes {stable_mosaic.version = 11 : i64} {
  func.func @_rmsnorm_packed_kernel(%arg0: i32, %arg1: memref<8x128xf32, #tpu.memory_space<vmem>>, %arg2: memref<1x128xf32, #tpu.memory_space<vmem>>, %arg3: memref<128x128xbf16, #tpu.memory_space<vmem>>, %arg4: memref<8x128xf32, #tpu.memory_space<vmem>>) attributes {dimension_semantics = [#tpu.dimension_semantics<parallel>], iteration_bounds = array<i64: 1>, scalar_prefetch = 0 : i64, scratch_operands = 0 : i64, tpu.core_type = #tpu.core_type<tc>, window_params = [{transform_indices = @transform_0, window_bounds = array<i64: 8, 128>}, {pipeline_mode = #tpu.pipeline_mode<synchronous>, transform_indices = @transform_1, window_bounds = array<i64: 1, 128>}, {pipeline_mode = #tpu.pipeline_mode<synchronous>, transform_indices = @transform_2, window_bounds = array<i64: 128, 128>}, {transform_indices = @transform_3, window_bounds = array<i64: 8, 128>}]} {
    %c0 = arith.constant 0 : index
    %c0_0 = arith.constant 0 : index
    %0 = vector.load %arg1[%c0, %c0_0] : memref<8x128xf32, #tpu.memory_space<vmem>>, vector<8x128xf32>
    %1 = arith.mulf %0, %0 : vector<8x128xf32>
    %2 = arith.truncf %1 : vector<8x128xf32> to vector<8x128xbf16>
    %3 = arith.extf %2 : vector<8x128xbf16> to vector<8x128xf32>
    %4 = arith.subf %1, %3 : vector<8x128xf32>
    %5 = arith.truncf %4 : vector<8x128xf32> to vector<8x128xbf16>
    %c0_1 = arith.constant 0 : index
    %c0_2 = arith.constant 0 : index
    %6 = vector.load %arg3[%c0_1, %c0_2] : memref<128x128xbf16, #tpu.memory_space<vmem>>, vector<128x128xbf16>
    %cst = arith.constant dense<0.000000e+00> : vector<8x128xf32>
    %7 = tpu.matmul %2, %6, %cst {dimension_numbers = #tpu.dot_dimension_numbers<[1], [0], [0], [1], [0, 0, 1, 1], [], []>} : vector<8x128xbf16>, vector<128x128xbf16>, vector<8x128xf32> -> vector<8x128xf32>
    %cst_3 = arith.constant dense<0.000000e+00> : vector<8x128xf32>
    %8 = tpu.matmul %5, %6, %cst_3 {dimension_numbers = #tpu.dot_dimension_numbers<[1], [0], [0], [1], [0, 0, 1, 1], [], []>} : vector<8x128xbf16>, vector<128x128xbf16>, vector<8x128xf32> -> vector<8x128xf32>
    %9 = arith.addf %7, %8 : vector<8x128xf32>
    %cst_4 = arith.constant 3.125000e-02 : f32
    %10 = vector.broadcast %cst_4 : f32 to vector<8x128xf32>
    %11 = arith.mulf %9, %10 : vector<8x128xf32>
    %cst_5 = arith.constant 9.99999974E-6 : f32
    %12 = vector.broadcast %cst_5 : f32 to vector<8x128xf32>
    %13 = arith.addf %11, %12 : vector<8x128xf32>
    %14 = math.rsqrt %13 : vector<8x128xf32>
    %15 = arith.mulf %0, %14 : vector<8x128xf32>
    %c0_6 = arith.constant 0 : index
    %c0_7 = arith.constant 0 : index
    %16 = vector.load %arg2[%c0_6, %c0_7] : memref<1x128xf32, #tpu.memory_space<vmem>>, vector<1x128xf32>
    %17 = vector.broadcast %16 : vector<1x128xf32> to vector<8x128xf32>
    %18 = arith.mulf %15, %17 : vector<8x128xf32>
    %c0_8 = arith.constant 0 : index
    %c0_9 = arith.constant 0 : index
    %19 = vector.load %arg4[%c0_8, %c0_9] : memref<8x128xf32, #tpu.memory_space<vmem>>, vector<8x128xf32>
    tpu.vector_store %arg4[%c0_8, %c0_9], %18 {strides = array<i32>} : memref<8x128xf32, #tpu.memory_space<vmem>>, vector<8x128xf32>,
    return
  }
  func.func @transform_0(%arg0: i32) -> (i32, i32) {
    %c0_i32 = arith.constant 0 : i32
    %c0_i32_0 = arith.constant 0 : i32
    return %arg0, %c0_i32 : i32, i32
  }
  func.func @transform_1(%arg0: i32) -> (i32, i32) {
    %c0_i32 = arith.constant 0 : i32
    %c0_i32_0 = arith.constant 0 : i32
    %c0_i32_1 = arith.constant 0 : i32
    return %c0_i32, %c0_i32_0 : i32, i32
  }
  func.func @transform_2(%arg0: i32) -> (i32, i32) {
    %c0_i32 = arith.constant 0 : i32
    %c0_i32_0 = arith.constant 0 : i32
    %c0_i32_1 = arith.constant 0 : i32
    return %c0_i32, %c0_i32_0 : i32, i32
  }
  func.func @transform_3(%arg0: i32) -> (i32, i32) {
    %c0_i32 = arith.constant 0 : i32
    %c0_i32_0 = arith.constant 0 : i32
    return %arg0, %c0_i32 : i32, i32
  }
}

</mosaic_0001>

<bundles_post_ra>
// kernel: tpu_custom_call.1
= control target key start
LH: loop header
LB: loop body
LE: loop exit
PB: predicated region body
PF: predicated region fallthrough
CT: control target
= control target key end

     0   :  { %8 = vsyncpa [#allocation3], 0  ;;  %s457_s0 = inlined_call_operand.hbm [shape: f32[4,128], index: 0, kind: input, shape index: {}]   ;;  %s458_s1 = inlined_call_operand.vmem [shape: f32[1,128], index: 1, kind: input, shape index: {}]   ;;  %s459_s2 = inlined_call_operand.hbm [shape: bf16[128,128], index: 2, kind: input, shape index: {}]   ;;  %s460_s3 = inlined_call_operand.hbm [shape: f32[4,128], index: 3, kind: output, shape index: {}]  }
   0x1   :  { %9 = vsyncpa [#allocation6], 0 }
   0x2   :  { %10 = vsyncpa [#allocation4], 0 }
   0x3   :  { %15 = vsyncadd [#allocation3], 64  ;;  %s382_s12 = smov [#allocation2]   ;;  %s310_s16 = scalar_lea.hbm %s457_s0, 64 }
   0x4   :  { %s16_s13 = sshll.u32 %s382_s12, 4  ;;  %p311_p0 = scmp.ne.s32.totalorder %s457_s0, %s310_s16  ;;  %s17_s13 = int_to_ptr.vmem [resolvable:$true] %s16_s13 }
   0x5   :  { %p314_p1 = scmp.lt.u32.totalorder %s310_s16, %s457_s0 }
   0x7   :  { %p316_p2 = pnand %p314_p1, %p311_p0 }
   0x9   :  { %319 = shalt.err (!%p316_p2)
}
   0xa   :  { %s320_s21 = scalar_lea.vmem %s17_s13, 64  ;;  %s324_s22 = scalar_lea.vmem %s17_s13, 128 }
   0xb   :  { %p321_p3 = scmp.ne.s32.totalorder %s17_s13, %s320_s21  ;;  %p325_p4 = scmp.lt.s32.totalorder %s17_s13, %s17_s13 }
   0xc   :  { %p326_p5 = scmp.lt.s32.totalorder %s324_s22, %s320_s21 }
   0xe   :  { %p327_p6 = por %p326_p5, %p325_p4 }
  0x10   :  { %p328_p7 = pnand %p327_p6, %p321_p3 }
  0x12   :  { %331 = shalt.err (!%p328_p7)
}
  0x13   :  { %s383_s23 = smov 64   ;;  %s384_s24 = smov 4  }
  0x14   :  { %22 = dma.hbm_to_vmem [thread:$0]  %s457_s0, 64, %s17_s13, [#allocation3], %s383_s23, %s383_s23, %s384_s24  }
  0x15   :  { %s385_s27 = smov [#allocation5]   ;;  %s332_s4 = scalar_lea.hbm %s459_s2, 1024 }
  0x16   :  { %s30_s28 = sshll.u32 %s385_s27, 4  ;;  %p333_p8 = scmp.ne.s32.totalorder %s459_s2, %s332_s4  ;;  %s31_s28 = int_to_ptr.vmem [resolvable:$true] %s30_s28 }
  0x17   :  { %p336_p9 = scmp.lt.u32.totalorder %s332_s4, %s459_s2 }
  0x19   :  { %p338_p10 = pnand %p336_p9, %p333_p8 }
  0x1b   :  { %341 = shalt.err (!%p338_p10)
}
  0x1c   :  { %s342_s9 = scalar_lea.vmem %s31_s28, 1024  ;;  %p347_p12 = scmp.lt.s32.totalorder %s31_s28, %s31_s28 }
  0x1d   :  { %p343_p11 = scmp.ne.s32.totalorder %s31_s28, %s342_s9  ;;  %p348_p13 = scmp.lt.s32.totalorder %s342_s9, %s342_s9 }
  0x1f   :  { %p349_p0 = por %p348_p13, %p347_p12 }
  0x21   :  { %p350_p1 = pnand %p349_p0, %p343_p11 }
  0x23   :  { %353 = shalt.err (!%p350_p1)
}
  0x24   :  { %36 = dma.hbm_to_vmem [thread:$0]  %s459_s2, 1024, %s31_s28, [#allocation6], %s383_s23, %s383_s23, %s384_s24  }
  0x25   :  { %376 = dma.done.wait [#allocation3], 128  }
  0x26   :  { %377 = vsyncadd [#allocation3], 4294967168 }
  0x27   :  { %378 = dma.done.wait [#allocation6], 1024  }
  0x28   :  { %379 = vsyncadd [#allocation6], 4294966272  ;;  %v386_v0 = vmov 0.0   ;;  %vm387_vm0 = vmmov 0   ;;  %v300_v1 = vld [vmem:[#allocation5] sm:$0xff]   ;;  %v301_v2 = vld [vmem:[#allocation5 + $0x8] sm:$0xff]  }
  0x29   :  { %252 = vmatprep.subr.bf16.mxu1 %v386_v0  ;;  %272 = vmatprep.subr.bf16.mxu0 %v386_v0  ;;  %v302_v3 = vld [vmem:[#allocation5 + $0x10] sm:$0xff]   ;;  %v303_v4 = vld [vmem:[#allocation5 + $0x18] sm:$0xff]   ;;  %v304_v7 = vld [vmem:[#allocation5 + $0x20] sm:$0xff]  }
  0x2a   :  { %268 = vmatprep.mubr.msk.bf16.mxu1 %vm387_vm0, %v386_v0  ;;  %288 = vmatprep.mubr.msk.bf16.mxu0 %vm387_vm0, %v386_v0  ;;  %v44_v5 = vld [vmem:[#allocation2] sm:$0xff]  ;;  %v305_v9 = vld [vmem:[#allocation5 + $0x28] sm:$0xff]   ;;  %v306_v11 = vld [vmem:[#allocation5 + $0x30] sm:$0xff]  }
  0x2b   :  { %253 = vmatpush3.bf16.msra.mxu1 %v300_v1  ;;  %273 = vmatpush3.bf16.msra.mxu0 %v300_v1  ;;  %v45_v6 = vmul.f32 %v44_v5, %v44_v5  ;;  %v307_v13 = vld [vmem:[#allocation5 + $0x38] sm:$0xff]  }
  0x2c   :  { %254 = vmatprep.subr.bf16.mxu1 %v386_v0  ;;  %274 = vmatprep.subr.bf16.mxu0 %v386_v0  ;;  %v233_v27 = vld [vmem:[%s458_s1] ss:$0 sm:$0xff] }
  0x2d   :  { %v46_v8 = vpack.c.bf16 %v45_v6, %v45_v6 }
  0x2f   :  { %255 = vmatpush3.bf16.msra.mxu1 %v301_v2  ;;  %275 = vmatpush3.bf16.msra.mxu0 %v301_v2  ;;  %v47_v10 = vunpack.c.l.bf16 %v46_v8 }
  0x30   :  { %256 = vmatprep.subr.bf16.mxu1 %v386_v0  ;;  %276 = vmatprep.subr.bf16.mxu0 %v386_v0 }
  0x31   :  { %v48_v12 = vsub.f32 %v45_v6, %v47_v10 }
  0x33   :  { %257 = vmatpush3.bf16.msra.mxu1 %v302_v3  ;;  %277 = vmatpush3.bf16.msra.mxu0 %v302_v3  ;;  %v49_v14 = vpack.c.bf16 %v48_v12, %v48_v12 }
  0x34   :  { %258 = vmatprep.subr.bf16.mxu1 %v386_v0  ;;  %278 = vmatprep.subr.bf16.mxu0 %v386_v0 }
  0x37   :  { %259 = vmatpush3.bf16.msra.mxu1 %v303_v4  ;;  %279 = vmatpush3.bf16.msra.mxu0 %v303_v4 }
  0x38   :  { %260 = vmatprep.subr.bf16.mxu1 %v386_v0  ;;  %280 = vmatprep.subr.bf16.mxu0 %v386_v0 }
  0x3b   :  { %261 = vmatpush3.bf16.msra.mxu1 %v304_v7  ;;  %281 = vmatpush3.bf16.msra.mxu0 %v304_v7 }
  0x3c   :  { %262 = vmatprep.subr.bf16.mxu1 %v386_v0  ;;  %282 = vmatprep.subr.bf16.mxu0 %v386_v0 }
  0x3f   :  { %263 = vmatpush3.bf16.msra.mxu1 %v305_v9  ;;  %283 = vmatpush3.bf16.msra.mxu0 %v305_v9 }
  0x40   :  { %264 = vmatprep.subr.bf16.mxu1 %v386_v0  ;;  %284 = vmatprep.subr.bf16.mxu0 %v386_v0 }
  0x43   :  { %265 = vmatpush3.bf16.msra.mxu1 %v306_v11  ;;  %285 = vmatpush3.bf16.msra.mxu0 %v306_v11 }
  0x44   :  { %266 = vmatprep.subr.bf16.mxu1 %v386_v0  ;;  %286 = vmatprep.subr.bf16.mxu0 %v386_v0 }
  0x47   :  { %267 = vmatpush3.bf16.msra.mxu1 %v307_v13  ;;  %287 = vmatpush3.bf16.msra.mxu0 %v307_v13 }
  0x4a   :  { %269 = vmatmul.mubr.bf16.vlgmr.msra.gmra.mrb[0].mxu1 %v49_v14  ;;  %289 = vmatmul.mubr.bf16.vlgmr.msra.gmra.mrb[0].mxu0 %v46_v8 }
 0x11d   :  { %v148_v15 = vpop.f32.mrb[0].mxu1  ;;  %v188_v16 = vpop.f32.mrb[0].mxu0 }
 0x11e   :  { %v189_v17 = vadd.f32 %v188_v16, %v148_v15  ;;  %v270_v18 = vpop.f32.mrb[1].mxu1  ;;  %v290_v19 = vpop.f32.mrb[1].mxu0 }
 0x11f   :  { %v151_v20 = vpop.f32.mrb[2].mxu1  ;;  %v191_v21 = vpop.f32.mrb[2].mxu0 }
 0x120   :  { %v194_v22 = vmul.f32 0.03125, %v189_v17  ;;  %v271_v23 = vpop.f32.mrb[3].mxu1  ;;  %v291_v24 = vpop.f32.mrb[3].mxu0 }
 0x122   :  { %v195_v25 = vadd.f32 1e-05, %v194_v22 }
 0x124   :  { %308 = vrsqrt.f32 %v195_v25 }
 0x12e   :  { %v309_v26 = vpop.eup %308 }
 0x12f   :  { %v197_v28 = vmul.f32 %v309_v26, %v44_v5 }
 0x131   :  { %v205_v29 = vmul.f32 %v233_v27, %v197_v28 }
 0x133   :  { %206 = vst [vmem:[#allocation7] sm:$0xff] %v205_v29 }
 0x134   :  { %211 = vsyncadd [#allocation4], 64  ;;  %s388_s12 = smov [#allocation7]  }
 0x135   :  { %s212_s13 = sshll.u32 %s388_s12, 4  ;;  %s213_s13 = int_to_ptr.vmem [resolvable:$true] %s212_s13 }
 0x136   :  { %s354_s14 = scalar_lea.vmem %s213_s13, 64  ;;  %s358_s15 = scalar_lea.vmem %s213_s13, 128 }
 0x137   :  { %p355_p2 = scmp.ne.s32.totalorder %s213_s13, %s354_s14  ;;  %p359_p3 = scmp.lt.s32.totalorder %s213_s13, %s213_s13 }
 0x138   :  { %p360_p4 = scmp.lt.s32.totalorder %s358_s15, %s354_s14 }
 0x13a   :  { %p361_p5 = por %p360_p4, %p359_p3 }
 0x13c   :  { %p362_p6 = pnand %p361_p5, %p355_p2 }
 0x13e   :  { %365 = shalt.err (!%p362_p6)
}
 0x13f   :  { %s366_s18 = scalar_lea.hbm %s460_s3, 64 }
 0x140   :  { %p367_p7 = scmp.ne.s32.totalorder %s460_s3, %s366_s18  ;;  %p370_p8 = scmp.lt.u32.totalorder %s366_s18, %s460_s3 }
 0x142   :  { %p372_p9 = pnand %p370_p8, %p367_p7 }
 0x144   :  { %375 = shalt.err (!%p372_p9)
}
 0x145   :  { %218 = dma.vmem_to_hbm [thread:$0]  %s213_s13, 64, %s460_s3, [#allocation4], %s383_s23, %s383_s23, %s384_s24  }
 0x146   :  { %380 = dma.done.wait [#allocation4], 128  }
 0x147   :  { %381 = vsyncadd [#allocation4], 4294967168 }
 0x148   :  { %222 = vsyncpa [#allocation3], 1 }
 0x149   :  { %223 = vsyncpa [#allocation6], 1 }
 0x14a   :  { %224 = vsyncpa [#allocation4], 1 }

</bundles_post_ra>
